<compile_context>
chip_gen: v6e
topology: v6e:2x2x1
jax: 0.10.0
libtpu: 0.0.40
codegen_flags: <defaults>
</compile_context>

<pallas_src>
import functools

import jax
import jax.numpy as jnp
from jax.experimental import pallas as pl
from jax.experimental.pallas import tpu as pltpu

LANES = 128
TM_MAX = 2048   # rows per block -> (2048, 128) f32 = 1 MiB/block, 2 MiB double-buffered
NC = 2          # leading "parallel" grid axis (2 TensorCores on v7x; harmless elsewhere)


def _bce_ss_kernel(x_ref, o_ref, *, target, tail_valid, n_tiles, tiles_per_core, tm):
    """Per-tile stable BCE-with-logits + vreg-resident partial-sum accumulation.

    x_ref : VMEM (tm, 128)    tile of flattened logits (native dtype, cast in-kernel)
    o_ref : VMEM (1, 8, 128)  per-core partial-sum accumulator (resident across k)
    """
    c = pl.program_id(0)            # parallel axis (core split)
    k = pl.program_id(1)            # reduction axis ("arbitrary")
    g = c * tiles_per_core + k      # global tile index

    @pl.when(k == 0)
    def _():
        o_ref[...] = jnp.zeros_like(o_ref)

    x = x_ref[...].astype(jnp.float32)
    # Numerically stable BCE-with-logits vs constant target t:
    #   max(x, 0) - x*t + log1p(exp(-|x|))
    loss = jnp.maximum(x, 0.0) - x * target + jnp.log1p(jnp.exp(-jnp.abs(x)))

    def vreg_sum(v):
        # (tm, 128) -> (1, 8, 128): adds whole vregs on the VPU, no cross-lane reduce.
        return v.reshape(1, tm // 8, 8, LANES).sum(axis=1)

    @pl.when(g < n_tiles - 1)
    def _():
        # Bulk tiles: unmasked fast path.
        o_ref[...] += vreg_sum(loss)

    @pl.when(g == n_tiles - 1)
    def _():
        # Only the final (possibly ragged) tile pays for the padding mask.
        row = jax.lax.broadcasted_iota(jnp.int32, (tm, LANES), 0)
        col = jax.lax.broadcasted_iota(jnp.int32, (tm, LANES), 1)
        idx = row * LANES + col     # index *within* this tile -> no int32 overflow risk
        o_ref[...] += vreg_sum(jnp.where(idx < tail_valid, loss, 0.0))
    # Tiles with g >= n_tiles (duplicates from the NC split) contribute nothing.


def bce_loss_ss(y_pred: jax.Array, y_label: float) -> jax.Array:
    """Pallas equivalent of BCELossSS()(y_pred, y_label). Returns scalar f32."""
    x = y_pred.reshape(-1)                  # keep native dtype; cast happens in-kernel
    total = int(x.shape[0])

    # Lane-pad only to the next multiple of 128 (no-op for typical NCHW shapes).
    rem = total % LANES
    if rem:
        x = jnp.pad(x, (0, LANES - rem))
    rows = x.shape[0] // LANES
    x2 = x.reshape(rows, LANES)

    # Ensure at least 8 rows so the (8, 128) sublane tile is well formed (tiny inputs).
    if rows < 8:
        x2 = jnp.pad(x2, ((0, 8 - rows), (0, 0)))
        rows = 8

    tm = min(TM_MAX, (rows // 8) * 8)       # multiple of 8, <= rows
    n_tiles = pl.cdiv(rows, tm)             # last tile may be ragged (masked in-kernel)
    nc = min(NC, n_tiles)
    tiles_per_core = pl.cdiv(n_tiles, nc)
    tail_valid = total - (n_tiles - 1) * tm * LANES   # valid elements in the final tile

    kernel = functools.partial(
        _bce_ss_kernel,
        target=float(y_label),
        tail_valid=tail_valid,
        n_tiles=n_tiles,
        tiles_per_core=tiles_per_core,
        tm=tm,
    )

    partials = pl.pallas_call(
        kernel,
        out_shape=jax.ShapeDtypeStruct((nc, 8, LANES), jnp.float32),
        grid_spec=pltpu.PrefetchScalarGridSpec(
            num_scalar_prefetch=0,
            grid=(nc, tiles_per_core),
            in_specs=[
                pl.BlockSpec(
                    (tm, LANES),
                    # Clamp duplicate tiles (g >= n_tiles) onto the last real block;
                    # their contribution is skipped inside the kernel.
                    lambda c, k: (jnp.minimum(c * tiles_per_core + k, n_tiles - 1), 0),
                ),
            ],
            out_specs=pl.BlockSpec((1, 8, LANES), lambda c, k: (c, 0, 0)),
        ),
        compiler_params=pltpu.CompilerParams(
            dimension_semantics=("parallel", "arbitrary"),
        ),
    )(x2)

    return jnp.sum(partials) / jnp.float32(total)


def _reference(y_pred, y_label):
    x = y_pred.astype(jnp.float32)
    t = jnp.float32(y_label)
    return jnp.mean(jnp.maximum(x, 0.0) - x * t + jnp.log1p(jnp.exp(-jnp.abs(x))))


if __name__ == "__main__":
    key = jax.random.PRNGKey(0)

    # Primary example: small NCHW logits consistent with the module's usage.
    y_pred = jax.random.normal(key, (2, 4, 16, 16), dtype=jnp.float32)
    y_label = 1.0
    loss = jax.block_until_ready(bce_loss_ss(y_pred, y_label))
    ref = _reference(y_pred, y_label)
    assert jnp.allclose(loss, ref, rtol=1e-4, atol=1e-6), (loss, ref)

    # Ragged shape (exercises lane/row padding + tail mask), label 0.0.
    k1, k2 = jax.random.split(key)
    y_rag = jax.random.normal(k1, (2, 3, 7, 11), dtype=jnp.float32)
    loss_r = jax.block_until_ready(bce_loss_ss(y_rag, 0.0))
    ref_r = _reference(y_rag, 0.0)
    assert jnp.allclose(loss_r, ref_r, rtol=1e-4, atol=1e-6), (loss_r, ref_r)

    # Multi-tile case (exercises the 2-way parallel split + resident accumulation).
    y_big = jax.random.normal(k2, (3, 16, 128, 128), dtype=jnp.float32)
    loss_b = jax.block_until_ready(bce_loss_ss(y_big, 1.0))
    ref_b = _reference(y_big, 1.0)
    assert jnp.allclose(loss_b, ref_b, rtol=1e-4, atol=1e-6), (loss_b, ref_b)

    print("KERNEL_OK")
</pallas_src>

<mosaic_0001>
module attributes {stable_mosaic.version = 11 : i64} {
  func.func @_bce_ss_kernel(%arg0: i32, %arg1: i32, %arg2: memref<16x128xf32, #tpu.memory_space<vmem>>, %arg3: memref<1x8x128xf32, #tpu.memory_space<vmem>>) attributes {dimension_semantics = [#tpu.dimension_semantics<parallel>, #tpu.dimension_semantics<arbitrary>], iteration_bounds = array<i64: 1, 1>, scalar_prefetch = 0 : i64, scratch_operands = 0 : i64, tpu.core_type = #tpu.core_type<tc>, window_params = [{transform_indices = @transform_0, window_bounds = array<i64: 16, 128>}, {transform_indices = @transform_1, window_bounds = array<i64: 1, 8, 128>}]} {
    %c1_i32 = arith.constant 1 : i32
    %0 = arith.muli %arg0, %c1_i32 : i32
    %1 = arith.addi %0, %arg1 : i32
    %c0_i32 = arith.constant 0 : i32
    %2 = arith.cmpi eq, %arg1, %c0_i32 : i32
    %3 = arith.extui %2 : i1 to i32
    %c0_i32_0 = arith.constant 0 : i32
    %4 = arith.cmpi ne, %3, %c0_i32_0 : i32
    scf.if %4 {
      %cst_8 = arith.constant 0.000000e+00 : f32
      %23 = vector.broadcast %cst_8 : f32 to vector<1x8x128xf32>
      %c0_9 = arith.constant 0 : index
      %c0_10 = arith.constant 0 : index
      %c0_11 = arith.constant 0 : index
      %24 = vector.load %arg3[%c0_9, %c0_10, %c0_11] : memref<1x8x128xf32, #tpu.memory_space<vmem>>, vector<1x8x128xf32>
      tpu.vector_store %arg3[%c0_9, %c0_10, %c0_11], %23 {strides = array<i32>} : memref<1x8x128xf32, #tpu.memory_space<vmem>>, vector<1x8x128xf32>,
    } else {
    }
    %c0 = arith.constant 0 : index
    %c0_1 = arith.constant 0 : index
    %5 = vector.load %arg2[%c0, %c0_1] : memref<16x128xf32, #tpu.memory_space<vmem>>, vector<16x128xf32>
    %cst = arith.constant 0.000000e+00 : f32
    %6 = vector.broadcast %cst : f32 to vector<16x128xf32>
    %7 = arith.maximumf %5, %6 : vector<16x128xf32>
    %cst_2 = arith.constant 1.000000e+00 : f32
    %8 = vector.broadcast %cst_2 : f32 to vector<16x128xf32>
    %9 = arith.mulf %5, %8 : vector<16x128xf32>
    %10 = arith.subf %7, %9 : vector<16x128xf32>
    %11 = math.absf %5 : vector<16x128xf32>
    %cst_3 = arith.constant 0.000000e+00 : f32
    %12 = vector.broadcast %cst_3 : f32 to vector<16x128xf32>
    %13 = arith.subf %12, %11 : vector<16x128xf32>
    %14 = math.exp %13 : vector<16x128xf32>
    %15 = math.log1p %14 : vector<16x128xf32>
    %16 = arith.addf %10, %15 : vector<16x128xf32>
    %c0_i32_4 = arith.constant 0 : i32
    %17 = arith.cmpi slt, %1, %c0_i32_4 : i32
    %18 = arith.extui %17 : i1 to i32
    %c0_i32_5 = arith.constant 0 : i32
    %19 = arith.cmpi ne, %18, %c0_i32_5 : i32
    scf.if %19 {
      %c0_8 = arith.constant 0 : index
      %c0_9 = arith.constant 0 : index
      %c0_10 = arith.constant 0 : index
      %23 = vector.load %arg3[%c0_8, %c0_9, %c0_10] : memref<1x8x128xf32, #tpu.memory_space<vmem>>, vector<1x8x128xf32>
      %24 = vector.shape_cast %16 : vector<16x128xf32> to vector<1x2x8x128xf32>
      %cst_11 = arith.constant dense<0.000000e+00> : vector<1x8x128xf32>
      %25 = vector.multi_reduction <add>, %24, %cst_11 [1] : vector<1x2x8x128xf32> to vector<1x8x128xf32>
      %26 = arith.addf %23, %25 : vector<1x8x128xf32>
      %c0_12 = arith.constant 0 : index
      %c0_13 = arith.constant 0 : index
      %c0_14 = arith.constant 0 : index
      %27 = vector.load %arg3[%c0_12, %c0_13, %c0_14] : memref<1x8x128xf32, #tpu.memory_space<vmem>>, vector<1x8x128xf32>
      tpu.vector_store %arg3[%c0_12, %c0_13, %c0_14], %26 {strides = array<i32>} : memref<1x8x128xf32, #tpu.memory_space<vmem>>, vector<1x8x128xf32>,
    } else {
    }
    %c0_i32_6 = arith.constant 0 : i32
    %20 = arith.cmpi eq, %1, %c0_i32_6 : i32
    %21 = arith.extui %20 : i1 to i32
    %c0_i32_7 = arith.constant 0 : i32
    %22 = arith.cmpi ne, %21, %c0_i32_7 : i32
    scf.if %22 {
      %23 = tpu.iota {dimensions = array<i32: 0>} : vector<16x128xi32>
      %24 = tpu.iota {dimensions = array<i32: 1>} : vector<16x128xi32>
      %c128_i32 = arith.constant 128 : i32
      %25 = vector.broadcast %c128_i32 : i32 to vector<16x128xi32>
      %26 = arith.muli %23, %25 : vector<16x128xi32>
      %27 = arith.addi %26, %24 : vector<16x128xi32>
      %c0_8 = arith.constant 0 : index
      %c0_9 = arith.constant 0 : index
      %c0_10 = arith.constant 0 : index
      %28 = vector.load %arg3[%c0_8, %c0_9, %c0_10] : memref<1x8x128xf32, #tpu.memory_space<vmem>>, vector<1x8x128xf32>
      %c2048_i32 = arith.constant 2048 : i32
      %29 = vector.broadcast %c2048_i32 : i32 to vector<16x128xi32>
      %30 = arith.cmpi slt, %27, %29 : vector<16x128xi32>
      %cst_11 = arith.constant 0.000000e+00 : f32
      %31 = vector.broadcast %cst_11 : f32 to vector<16x128xf32>
      %32 = arith.select %30, %16, %31 : vector<16x128xi1>, vector<16x128xf32>
      %33 = vector.shape_cast %32 : vector<16x128xf32> to vector<1x2x8x128xf32>
      %cst_12 = arith.constant dense<0.000000e+00> : vector<1x8x128xf32>
      %34 = vector.multi_reduction <add>, %33, %cst_12 [1] : vector<1x2x8x128xf32> to vector<1x8x128xf32>
      %35 = arith.addf %28, %34 : vector<1x8x128xf32>
      %c0_13 = arith.constant 0 : index
      %c0_14 = arith.constant 0 : index
      %c0_15 = arith.constant 0 : index
      %36 = vector.load %arg3[%c0_13, %c0_14, %c0_15] : memref<1x8x128xf32, #tpu.memory_space<vmem>>, vector<1x8x128xf32>
      tpu.vector_store %arg3[%c0_13, %c0_14, %c0_15], %35 {strides = array<i32>} : memref<1x8x128xf32, #tpu.memory_space<vmem>>, vector<1x8x128xf32>,
    } else {
    }
    return
  }
  func.func @transform_0(%arg0: i32, %arg1: i32) -> (i32, i32) {
    %c1_i32 = arith.constant 1 : i32
    %0 = arith.muli %arg0, %c1_i32 : i32
    %1 = arith.addi %0, %arg1 : i32
    %c0_i32 = arith.constant 0 : i32
    %2 = arith.minsi %1, %c0_i32 : i32
    %c0_i32_0 = arith.constant 0 : i32
    %c0_i32_1 = arith.constant 0 : i32
    return %2, %c0_i32_0 : i32, i32
  }
  func.func @transform_1(%arg0: i32, %arg1: i32) -> (i32, i32, i32) {
    %c0_i32 = arith.constant 0 : i32
    %c0_i32_0 = arith.constant 0 : i32
    %c0_i32_1 = arith.constant 0 : i32
    return %arg0, %c0_i32, %c0_i32_0 : i32, i32, i32
  }
}

</mosaic_0001>

<bundles_post_ra>
// kernel: tpu_custom_call.1
= control target key start
LH: loop header
LB: loop body
LE: loop exit
PB: predicated region body
PF: predicated region fallthrough
CT: control target
= control target key end

     0   :  { %6 = vsyncpa [#allocation3], 0  ;;  %s196_s0 = inlined_call_operand.hbm [shape: f32[16,128], index: 0, kind: input, shape index: {}]   ;;  %s197_s1 = inlined_call_operand.hbm [shape: f32[1,8,128], index: 1, kind: output, shape index: {}]  }
   0x1   :  { %7 = vsyncpa [#allocation4], 0  ;;  %s176_s6 = smov [#allocation2]  }
   0x2   :  { %s19_s7 = sshll.u32 %s176_s6, 4  ;;  %s20_s7 = int_to_ptr.vmem [resolvable:$true] %s19_s7 }
   0x3   :  { %s140_s8 = scalar_lea.vmem %s20_s7, 256  ;;  %p145_p1 = scmp.lt.s32.totalorder %s20_s7, %s20_s7 }
   0x4   :  { %p141_p0 = scmp.ne.s32.totalorder %s20_s7, %s140_s8  ;;  %p146_p2 = scmp.lt.s32.totalorder %s140_s8, %s140_s8 }
   0x6   :  { %p147_p3 = por %p146_p2, %p145_p1 }
   0x8   :  { %p148_p4 = pnand %p147_p3, %p141_p0 }
   0xa   :  { %151 = shalt.err (!%p148_p4)
}
   0xb   :  { %s177_s9 = smov 128   ;;  %s178_s10 = smov 8  }
   0xc   :  { %25 = dma.hbm_to_vmem [thread:$0]  %s196_s0, 256, %s20_s7, [#allocation3], %s177_s9, %s177_s9, %s178_s10  }
   0xd   :  { %172 = dma.done.wait [#allocation3], 256  }
   0xe   :  { %173 = vsyncadd [#allocation3], 4294967040  ;;  %v39_v0 = vld [vmem:[#allocation2] sm:$0xff]  ;;  %v40_v1 = vld [vmem:[#allocation2 + $0x8] sm:$0xff]  ;;  %v85_v9 = vlaneseq  ;;  %s179_s0 = smov [#allocation5]  }
   0xf   :  { %v45_v2 = vand.u32 2147483647, %v39_v0  ;;  %v46_v3 = vand.u32 2147483647, %v40_v1  ;;  %v41_v20 = vmax.f32 %v39_v0, 0.0  ;;  %v42_v24 = vmax.f32 %v40_v1, 0.0 }
  0x10   :  { %v86_v13 = vshrl.u32 %v85_v9, 7  ;;  %v89_v18 = vand.u32 127, %v85_v9  ;;  %s108_s13 = sshll.u32 %s179_s0, 4  ;;  %s109_s13 = int_to_ptr.vmem [resolvable:$true] %s108_s13 }
  0x11   :  { %v47_v4 = vsub.f32 0.0, %v45_v2  ;;  %v48_v5 = vsub.f32 0.0, %v46_v3  ;;  %v43_v29 = vsub.f32 %v41_v20, %v39_v0  ;;  %v44_v33 = vsub.f32 %v42_v24, %v40_v1  ;;  %s152_s14 = scalar_lea.vmem %s109_s13, 128  ;;  %p157_p6 = scmp.lt.s32.totalorder %s109_s13, %s109_s13 }
  0x12   :  { %v87_v16 = vadd.s32 8, %v86_v13  ;;  %v90_v19 = vmul.u32 128, %v86_v13  ;;  %p153_p5 = scmp.ne.s32.totalorder %s109_s13, %s152_s14  ;;  %p158_p7 = scmp.lt.s32.totalorder %s152_s14, %s152_s14 }
  0x13   :  { %v49_v6 = vmul.f32 1.442695, %v47_v4  ;;  %v51_v7 = vmul.f32 1.442695, %v48_v5 }
  0x14   :  { %v91_v23 = vmul.u32 128, %v87_v16  ;;  %v92_v27 = vadd.s32 %v90_v19, %v89_v18  ;;  %p159_p8 = por %p158_p7, %p157_p6 }
  0x15   :  { %124 = vpow2.f32 %v49_v6 }
  0x16   :  { %126 = vpow2.f32 %v51_v7  ;;  %v93_v31 = vadd.s32 %v91_v23, %v89_v18  ;;  %vm95_vm2 = vcmp.lt.s32.totalorder %v92_v27, 2048  ;;  %p160_p9 = pnand %p159_p8, %p153_p5 }
  0x18   :  { %vm96_vm3 = vcmp.lt.s32.totalorder %v93_v31, 2048 }
  0x22   :  { %v125_v8 = vpop.eup %124 }
  0x23   :  { %v127_v10 = vpop.eup %126  ;;  %v53_v11 = vadd.f32 1.0, %v125_v8  ;;  %v56_v14 = vmul.f32 -0.5, %v125_v8  ;;  %v59_v21 = vand.u32 2147483647, %v125_v8 }
  0x24   :  { %v62_v12 = vadd.f32 1.0, %v127_v10  ;;  %v65_v15 = vmul.f32 -0.5, %v127_v10  ;;  %v68_v25 = vand.u32 2147483647, %v127_v10 }
  0x25   :  { %128 = vlog2.f32 %v53_v11  ;;  %v57_v17 = vadd.f32 1.0, %v56_v14  ;;  %vm60_vm0 = vcmp.lt.f32.partialorder %v59_v21, 0.0004427343 }
  0x26   :  { %130 = vlog2.f32 %v62_v12  ;;  %v66_v22 = vadd.f32 1.0, %v65_v15  ;;  %vm69_vm1 = vcmp.lt.f32.partialorder %v68_v25, 0.0004427343 }
  0x27   :  { %v58_v26 = vmul.f32 %v125_v8, %v57_v17 }
  0x28   :  { %v67_v30 = vmul.f32 %v127_v10, %v66_v22 }
  0x32   :  { %v129_v28 = vpop.eup %128 }
  0x33   :  { %v131_v32 = vpop.eup %130  ;;  %v55_v34 = vmul.f32 0.6931472, %v129_v28 }
  0x34   :  { %v64_v35 = vmul.f32 0.6931472, %v131_v32 }
  0x35   :  { %v61_v36 = vsel %vm60_vm0, %v58_v26, %v55_v34 }
  0x36   :  { %v70_v37 = vsel %vm69_vm1, %v67_v30, %v64_v35  ;;  %v71_v38 = vadd.f32 %v61_v36, %v43_v29 }
  0x37   :  { %v72_v39 = vadd.f32 %v70_v37, %v44_v33 }
  0x38   :  { %v97_v40 = vsel %vm95_vm2, %v71_v38, 0.0 }
  0x39   :  { %v98_v41 = vsel %vm96_vm3, %v72_v39, 0.0 }
  0x3a   :  { %v99_v42 = vadd.f32 %v98_v41, %v97_v40 }
  0x3c   :  { %101 = vst [vmem:[#allocation5] sm:$0xff] %v99_v42 }
  0x3d   :  { %163 = shalt.err (!%p160_p9)
}
  0x3e   :  { %111 = dma.vmem_to_hbm [thread:$0]  %s109_s13, 128, %s197_s1, [#allocation4]  }
  0x3f   :  { %174 = dma.done.wait [#allocation4], 128  }
  0x40   :  { %175 = vsyncadd [#allocation4], 4294967168 }
  0x41   :  { %115 = vsyncpa [#allocation3], 1 }
  0x42   :  { %116 = vsyncpa [#allocation4], 1 }

</bundles_post_ra>
